<compile_context>
chip_gen: v6e
topology: v6e:2x2x1
jax: 0.10.0
libtpu: 0.0.40
codegen_flags: <defaults>
</compile_context>

<pallas_src>
import math

import jax
import jax.numpy as jnp
from jax import lax
from jax.experimental import pallas as pl
from jax.experimental.pallas import tpu as pltpu

# ---- problem sizes (small, consistent with the module) ----
B = 2            # batch
S = 8            # sequence length
D_MODEL = 32     # d_model
N_HEADS = 4      # h
D_K = D_MODEL // N_HEADS
D_FF = 64        # feed-forward hidden size
EPS = 1e-6       # LayerNormalization eps
BS = B * S       # folded rows

# rows of the packed (8, 128) small-vector parameter block
ROW_LN1_A, ROW_LN1_B = 0, 1
ROW_LN2_A, ROW_LN2_B = 2, 3
ROW_LNF_A, ROW_LNF_B = 4, 5
ROW_B1, ROW_B2 = 6, 7


def _layernorm(z, alpha, beta):
    # Matches the module's LayerNormalization exactly:
    #   mean over last dim, UNBIASED std (torch.std default, ddof=1),
    #   alpha * (x - mean) / (std + eps) + bias
    mean = jnp.mean(z, axis=-1, keepdims=True)
    zc = z - mean
    var = jnp.sum(zc * zc, axis=-1, keepdims=True) * (1.0 / (D_MODEL - 1))
    std = jnp.sqrt(var)
    return alpha * zc / (std + EPS) + beta            # exact division (accuracy)


def encoder_kernel(x_ref, bias_ref, vec_ref, wqkvo_ref, w1_ref, w2_ref, out_ref):
    x = x_ref[...]                                    # (B*S, D)
    bias = bias_ref[...]                              # (B*S, B*S) additive attn bias
    vecs = vec_ref[...]                               # (8, 128) packed tiny params

    ln1_a = vecs[ROW_LN1_A:ROW_LN1_A + 1, :D_MODEL]
    ln1_b = vecs[ROW_LN1_B:ROW_LN1_B + 1, :D_MODEL]
    ln2_a = vecs[ROW_LN2_A:ROW_LN2_A + 1, :D_MODEL]
    ln2_b = vecs[ROW_LN2_B:ROW_LN2_B + 1, :D_MODEL]
    lnf_a = vecs[ROW_LNF_A:ROW_LNF_A + 1, :D_MODEL]
    lnf_b = vecs[ROW_LNF_B:ROW_LNF_B + 1, :D_MODEL]
    b1 = vecs[ROW_B1:ROW_B1 + 1, :D_FF]
    b2 = vecs[ROW_B2:ROW_B2 + 1, :D_MODEL]

    # ---------- residual connection 1: self-attention ----------
    y = _layernorm(x, ln1_a, ln1_b)

    w_all = wqkvo_ref[...]                            # (D, 4D) = (32, 128) lane-dense
    qkv = jnp.dot(y, w_all[:, :3 * D_MODEL],          # single fused QKV matmul
                  preferred_element_type=jnp.float32)  # (16, 96)
    wo = w_all[:, 3 * D_MODEL:]                       # (32, 32)

    q = qkv[:, :D_MODEL] * (1.0 / math.sqrt(D_K))     # 1/sqrt(d_k) folded into q once
    k = qkv[:, D_MODEL:2 * D_MODEL]
    v = qkv[:, 2 * D_MODEL:]

    # Per-head attention; heads lane-concatenated, then ONE fused W_O matmul.
    ctx_heads = []
    for hh in range(N_HEADS):                         # small static unroll
        sl = slice(hh * D_K, (hh + 1) * D_K)
        qh, kh, vh = q[:, sl], k[:, sl], v[:, sl]
        s = lax.dot_general(qh, kh, (((1,), (1,)), ((), ())),
                            preferred_element_type=jnp.float32) + bias
        s = s - jnp.max(s, axis=-1, keepdims=True)
        p = jnp.exp(s)
        p = p / jnp.sum(p, axis=-1, keepdims=True)    # exact softmax denominator
        ctx_heads.append(jnp.dot(p, vh, preferred_element_type=jnp.float32))
    ctx = jnp.concatenate(ctx_heads, axis=-1)         # (B*S, D)
    x1 = x + jnp.dot(ctx, wo, preferred_element_type=jnp.float32)

    # ---------- residual connection 2: feed-forward ----------
    y2 = _layernorm(x1, ln2_a, ln2_b)
    h1 = jnp.maximum(
        jnp.dot(y2, w1_ref[...], preferred_element_type=jnp.float32) + b1, 0.0)
    x2 = x1 + jnp.dot(h1, w2_ref[...], preferred_element_type=jnp.float32) + b2

    # ---------- final Encoder LayerNorm ----------
    out_ref[...] = _layernorm(x2, lnf_a, lnf_b)


def pack_params(params):
    """Pack tiny vectors into one (8,128) block and QKV/O weights into (32,128)."""
    vecs = jnp.zeros((8, 128), jnp.float32)
    vecs = vecs.at[ROW_LN1_A, :D_MODEL].set(params["ln1_a"].reshape(-1))
    vecs = vecs.at[ROW_LN1_B, :D_MODEL].set(params["ln1_b"].reshape(-1))
    vecs = vecs.at[ROW_LN2_A, :D_MODEL].set(params["ln2_a"].reshape(-1))
    vecs = vecs.at[ROW_LN2_B, :D_MODEL].set(params["ln2_b"].reshape(-1))
    vecs = vecs.at[ROW_LNF_A, :D_MODEL].set(params["lnf_a"].reshape(-1))
    vecs = vecs.at[ROW_LNF_B, :D_MODEL].set(params["lnf_b"].reshape(-1))
    vecs = vecs.at[ROW_B1, :D_FF].set(params["b1"].reshape(-1))
    vecs = vecs.at[ROW_B2, :D_MODEL].set(params["b2"].reshape(-1))
    w_qkvo = jnp.concatenate(
        [params["wq_t"], params["wk_t"], params["wv_t"], params["wo_t"]], axis=1)
    return vecs, w_qkvo                               # (8,128), (32,128)


def encoder_forward(x, mask, params):
    """x: (B, S, D_MODEL) f32, mask: (B, 1, S) f32 (1 attend / 0 masked)."""
    x2d = x.reshape(BS, D_MODEL)                      # free contiguous reshape

    # Hoisted additive attention bias (built in XLA, not in the kernel):
    #   key-padding bias (-1e9 where mask==0) + block-diagonal batch bias
    #   (a query row only attends within its own batch element in the folded
    #   (B*S, B*S) score matrix).
    mask_flat = mask.reshape(1, BS)
    key_bias = jnp.where(mask_flat == 0, -1e9, 0.0)
    row_b = jnp.arange(BS)[:, None] // S
    col_b = jnp.arange(BS)[None, :] // S
    blk_bias = jnp.where(row_b == col_b, 0.0, -1e9)
    attn_bias = (blk_bias + key_bias).astype(jnp.float32)   # (B*S, B*S)

    vecs, w_qkvo = pack_params(params)

    vmem = pl.BlockSpec(memory_space=pltpu.MemorySpace.VMEM)  # whole array resident
    out2d = pl.pallas_call(
        encoder_kernel,
        out_shape=jax.ShapeDtypeStruct((BS, D_MODEL), jnp.float32),
        in_specs=[vmem] * 6,
        out_specs=vmem,
    )(x2d, attn_bias, vecs, w_qkvo, params["w1_t"], params["w2_t"])
    return out2d.reshape(B, S, D_MODEL)


def ref_forward(x, mask, p):
    """Pure-JAX reference mirroring the PyTorch Encoder forward (eval mode)."""
    def ln(z, a, b):
        mean = z.mean(-1, keepdims=True)
        std = jnp.sqrt(((z - mean) ** 2).sum(-1, keepdims=True) / (D_MODEL - 1))
        return a * (z - mean) / (std + EPS) + b

    y = ln(x, p["ln1_a"], p["ln1_b"])
    q = y @ p["wq_t"]
    k = y @ p["wk_t"]
    v = y @ p["wv_t"]

    def split(t):
        return t.reshape(B, S, N_HEADS, D_K).transpose(0, 2, 1, 3)

    qh, kh, vh = split(q), split(k), split(v)
    sc = (qh @ kh.transpose(0, 1, 3, 2)) / math.sqrt(D_K)
    m = mask[:, None, :, :]                           # (B,1,1,S)
    sc = jnp.where(m == 0, -1000000000.0, sc)
    attn = jax.nn.softmax(sc, axis=-1)
    o = (attn @ vh).transpose(0, 2, 1, 3).reshape(B, S, D_MODEL)
    x1 = x + o @ p["wo_t"]

    y2 = ln(x1, p["ln2_a"], p["ln2_b"])
    ff = jnp.maximum(y2 @ p["w1_t"] + p["b1"], 0.0) @ p["w2_t"] + p["b2"]
    x2 = x1 + ff
    return ln(x2, p["lnf_a"], p["lnf_b"])


def init_params(key):
    ks = jax.random.split(key, 14)
    scale = 0.1
    return {
        # LayerNormalization params (perturbed from the torch init to exercise them)
        "ln1_a": 1.0 + scale * jax.random.normal(ks[0], (1, D_MODEL), jnp.float32),
        "ln1_b": scale * jax.random.normal(ks[1], (1, D_MODEL), jnp.float32),
        "ln2_a": 1.0 + scale * jax.random.normal(ks[2], (1, D_MODEL), jnp.float32),
        "ln2_b": scale * jax.random.normal(ks[3], (1, D_MODEL), jnp.float32),
        "lnf_a": 1.0 + scale * jax.random.normal(ks[4], (1, D_MODEL), jnp.float32),
        "lnf_b": scale * jax.random.normal(ks[5], (1, D_MODEL), jnp.float32),
        # attention projections, stored pre-transposed as (in, out)
        "wq_t": scale * jax.random.normal(ks[6], (D_MODEL, D_MODEL), jnp.float32),
        "wk_t": scale * jax.random.normal(ks[7], (D_MODEL, D_MODEL), jnp.float32),
        "wv_t": scale * jax.random.normal(ks[8], (D_MODEL, D_MODEL), jnp.float32),
        "wo_t": scale * jax.random.normal(ks[9], (D_MODEL, D_MODEL), jnp.float32),
        # feed-forward, pre-transposed
        "w1_t": scale * jax.random.normal(ks[10], (D_MODEL, D_FF), jnp.float32),
        "b1": scale * jax.random.normal(ks[11], (1, D_FF), jnp.float32),
        "w2_t": scale * jax.random.normal(ks[12], (D_FF, D_MODEL), jnp.float32),
        "b2": scale * jax.random.normal(ks[13], (1, D_MODEL), jnp.float32),
    }


if __name__ == "__main__":
    key = jax.random.PRNGKey(0)
    k_x, k_p = jax.random.split(key)

    x = jax.random.normal(k_x, (B, S, D_MODEL), jnp.float32)
    # key-padding mask: last 2 positions of each sequence are padding
    mask = jnp.concatenate(
        [jnp.ones((B, 1, S - 2), jnp.float32), jnp.zeros((B, 1, 2), jnp.float32)],
        axis=-1)

    params = init_params(k_p)

    out = jax.block_until_ready(encoder_forward(x, mask, params))
    ref = ref_forward(x, mask, params)

    assert out.shape == (B, S, D_MODEL)
    max_err = float(jnp.max(jnp.abs(out - ref)))
    assert jnp.allclose(out, ref, rtol=2e-3, atol=2e-3), (
        f"mismatch vs reference (max abs err {max_err})")

    # TODO(synk): dropout is identity here (inference); training-mode dropout would
    # need pltpu.prng_seed / pltpu.prng_random_bits inside the kernel.
    print("KERNEL_OK")
</pallas_src>

<mosaic_0001>
module attributes {stable_mosaic.version = 11 : i64} {
  func.func @encoder_kernel(%arg0: memref<16x32xf32, #tpu.memory_space<vmem>>, %arg1: memref<16x16xf32, #tpu.memory_space<vmem>>, %arg2: memref<8x128xf32, #tpu.memory_space<vmem>>, %arg3: memref<32x128xf32, #tpu.memory_space<vmem>>, %arg4: memref<32x64xf32, #tpu.memory_space<vmem>>, %arg5: memref<64x32xf32, #tpu.memory_space<vmem>>, %arg6: memref<16x32xf32, #tpu.memory_space<vmem>>) attributes {dimension_semantics = [], scalar_prefetch = 0 : i64, scratch_operands = 0 : i64, tpu.core_type = #tpu.core_type<tc>} {
    %c0 = arith.constant 0 : index
    %c0_0 = arith.constant 0 : index
    %0 = vector.load %arg0[%c0, %c0_0] : memref<16x32xf32, #tpu.memory_space<vmem>>, vector<16x32xf32>
    %c0_1 = arith.constant 0 : index
    %c0_2 = arith.constant 0 : index
    %1 = vector.load %arg1[%c0_1, %c0_2] : memref<16x16xf32, #tpu.memory_space<vmem>>, vector<16x16xf32>
    %c0_3 = arith.constant 0 : index
    %c0_4 = arith.constant 0 : index
    %2 = vector.load %arg2[%c0_3, %c0_4] : memref<8x128xf32, #tpu.memory_space<vmem>>, vector<8x128xf32>
    %3 = vector.extract_strided_slice %2 {offsets = [0, 0], sizes = [1, 32], strides = [1, 1]} : vector<8x128xf32> to vector<1x32xf32>
    %4 = vector.extract_strided_slice %2 {offsets = [1, 0], sizes = [1, 32], strides = [1, 1]} : vector<8x128xf32> to vector<1x32xf32>
    %5 = vector.extract_strided_slice %2 {offsets = [2, 0], sizes = [1, 32], strides = [1, 1]} : vector<8x128xf32> to vector<1x32xf32>
    %6 = vector.extract_strided_slice %2 {offsets = [3, 0], sizes = [1, 32], strides = [1, 1]} : vector<8x128xf32> to vector<1x32xf32>
    %7 = vector.extract_strided_slice %2 {offsets = [4, 0], sizes = [1, 32], strides = [1, 1]} : vector<8x128xf32> to vector<1x32xf32>
    %8 = vector.extract_strided_slice %2 {offsets = [5, 0], sizes = [1, 32], strides = [1, 1]} : vector<8x128xf32> to vector<1x32xf32>
    %9 = vector.extract_strided_slice %2 {offsets = [6, 0], sizes = [1, 64], strides = [1, 1]} : vector<8x128xf32> to vector<1x64xf32>
    %10 = vector.extract_strided_slice %2 {offsets = [7, 0], sizes = [1, 32], strides = [1, 1]} : vector<8x128xf32> to vector<1x32xf32>
    %cst = arith.constant dense<0.000000e+00> : vector<16xf32>
    %11 = vector.multi_reduction <add>, %0, %cst [1] : vector<16x32xf32> to vector<16xf32>
    %12 = vector.shape_cast %11 : vector<16xf32> to vector<16x1xf32>
    %cst_5 = arith.constant 3.200000e+01 : f32
    %13 = vector.broadcast %cst_5 : f32 to vector<16x1xf32>
    %14 = arith.divf %12, %13 : vector<16x1xf32>
    %15 = vector.broadcast %14 : vector<16x1xf32> to vector<16x32xf32>
    %16 = arith.subf %0, %15 : vector<16x32xf32>
    %17 = arith.mulf %16, %16 : vector<16x32xf32>
    %cst_6 = arith.constant dense<0.000000e+00> : vector<16xf32>
    %18 = vector.multi_reduction <add>, %17, %cst_6 [1] : vector<16x32xf32> to vector<16xf32>
    %19 = vector.shape_cast %18 : vector<16xf32> to vector<16x1xf32>
    %cst_7 = arith.constant 0.0322580636 : f32
    %20 = vector.broadcast %cst_7 : f32 to vector<16x1xf32>
    %21 = arith.mulf %19, %20 : vector<16x1xf32>
    %22 = math.sqrt %21 : vector<16x1xf32>
    %23 = vector.broadcast %3 : vector<1x32xf32> to vector<16x32xf32>
    %24 = arith.mulf %23, %16 : vector<16x32xf32>
    %cst_8 = arith.constant 9.99999997E-7 : f32
    %25 = vector.broadcast %cst_8 : f32 to vector<16x1xf32>
    %26 = arith.addf %22, %25 : vector<16x1xf32>
    %27 = vector.broadcast %26 : vector<16x1xf32> to vector<16x32xf32>
    %28 = arith.divf %24, %27 : vector<16x32xf32>
    %29 = vector.broadcast %4 : vector<1x32xf32> to vector<16x32xf32>
    %30 = arith.addf %28, %29 : vector<16x32xf32>
    %c0_9 = arith.constant 0 : index
    %c0_10 = arith.constant 0 : index
    %31 = vector.load %arg3[%c0_9, %c0_10] : memref<32x128xf32, #tpu.memory_space<vmem>>, vector<32x128xf32>
    %32 = vector.extract_strided_slice %31 {offsets = [0, 0], sizes = [32, 96], strides = [1, 1]} : vector<32x128xf32> to vector<32x96xf32>
    %cst_11 = arith.constant dense<0.000000e+00> : vector<16x96xf32>
    %33 = tpu.matmul %30, %32, %cst_11 {dimension_numbers = #tpu.dot_dimension_numbers<[1], [0], [0], [1], [0, 0, 1, 1], [], []>} : vector<16x32xf32>, vector<32x96xf32>, vector<16x96xf32> -> vector<16x96xf32>
    %34 = vector.extract_strided_slice %31 {offsets = [0, 96], sizes = [32, 32], strides = [1, 1]} : vector<32x128xf32> to vector<32x32xf32>
    %35 = vector.extract_strided_slice %33 {offsets = [0, 0], sizes = [16, 32], strides = [1, 1]} : vector<16x96xf32> to vector<16x32xf32>
    %cst_12 = arith.constant 0.353553385 : f32
    %36 = vector.broadcast %cst_12 : f32 to vector<16x32xf32>
    %37 = arith.mulf %35, %36 : vector<16x32xf32>
    %38 = vector.extract_strided_slice %33 {offsets = [0, 32], sizes = [16, 32], strides = [1, 1]} : vector<16x96xf32> to vector<16x32xf32>
    %39 = vector.extract_strided_slice %33 {offsets = [0, 64], sizes = [16, 32], strides = [1, 1]} : vector<16x96xf32> to vector<16x32xf32>
    %40 = vector.extract_strided_slice %37 {offsets = [0, 0], sizes = [16, 8], strides = [1, 1]} : vector<16x32xf32> to vector<16x8xf32>
    %41 = vector.extract_strided_slice %38 {offsets = [0, 0], sizes = [16, 8], strides = [1, 1]} : vector<16x32xf32> to vector<16x8xf32>
    %42 = vector.extract_strided_slice %39 {offsets = [0, 0], sizes = [16, 8], strides = [1, 1]} : vector<16x32xf32> to vector<16x8xf32>
    %cst_13 = arith.constant dense<0.000000e+00> : vector<16x16xf32>
    %43 = tpu.matmul %40, %41, %cst_13 {dimension_numbers = #tpu.dot_dimension_numbers<[1], [1], [0], [0], [0, 0, 1, 0], [], []>} : vector<16x8xf32>, vector<16x8xf32>, vector<16x16xf32> -> vector<16x16xf32>
    %44 = arith.addf %43, %1 : vector<16x16xf32>
    %cst_14 = arith.constant dense<0xFF800000> : vector<16xf32>
    %45 = vector.multi_reduction <maximumf>, %44, %cst_14 [1] : vector<16x16xf32> to vector<16xf32>
    %46 = vector.shape_cast %45 : vector<16xf32> to vector<16x1xf32>
    %47 = vector.broadcast %46 : vector<16x1xf32> to vector<16x16xf32>
    %48 = arith.subf %44, %47 : vector<16x16xf32>
    %49 = math.exp %48 : vector<16x16xf32>
    %cst_15 = arith.constant dense<0.000000e+00> : vector<16xf32>
    %50 = vector.multi_reduction <add>, %49, %cst_15 [1] : vector<16x16xf32> to vector<16xf32>
    %51 = vector.shape_cast %50 : vector<16xf32> to vector<16x1xf32>
    %52 = vector.broadcast %51 : vector<16x1xf32> to vector<16x16xf32>
    %53 = arith.divf %49, %52 : vector<16x16xf32>
    %cst_16 = arith.constant dense<0.000000e+00> : vector<16x8xf32>
    %54 = tpu.matmul %53, %42, %cst_16 {dimension_numbers = #tpu.dot_dimension_numbers<[1], [0], [0], [1], [0, 0, 1, 1], [], []>} : vector<16x16xf32>, vector<16x8xf32>, vector<16x8xf32> -> vector<16x8xf32>
    %55 = vector.extract_strided_slice %37 {offsets = [0, 8], sizes = [16, 8], strides = [1, 1]} : vector<16x32xf32> to vector<16x8xf32>
    %56 = vector.extract_strided_slice %38 {offsets = [0, 8], sizes = [16, 8], strides = [1, 1]} : vector<16x32xf32> to vector<16x8xf32>
    %57 = vector.extract_strided_slice %39 {offsets = [0, 8], sizes = [16, 8], strides = [1, 1]} : vector<16x32xf32> to vector<16x8xf32>
    %cst_17 = arith.constant dense<0.000000e+00> : vector<16x16xf32>
    %58 = tpu.matmul %55, %56, %cst_17 {dimension_numbers = #tpu.dot_dimension_numbers<[1], [1], [0], [0], [0, 0, 1, 0], [], []>} : vector<16x8xf32>, vector<16x8xf32>, vector<16x16xf32> -> vector<16x16xf32>
    %59 = arith.addf %58, %1 : vector<16x16xf32>
    %cst_18 = arith.constant dense<0xFF800000> : vector<16xf32>
    %60 = vector.multi_reduction <maximumf>, %59, %cst_18 [1] : vector<16x16xf32> to vector<16xf32>
    %61 = vector.shape_cast %60 : vector<16xf32> to vector<16x1xf32>
    %62 = vector.broadcast %61 : vector<16x1xf32> to vector<16x16xf32>
    %63 = arith.subf %59, %62 : vector<16x16xf32>
    %64 = math.exp %63 : vector<16x16xf32>
    %cst_19 = arith.constant dense<0.000000e+00> : vector<16xf32>
    %65 = vector.multi_reduction <add>, %64, %cst_19 [1] : vector<16x16xf32> to vector<16xf32>
    %66 = vector.shape_cast %65 : vector<16xf32> to vector<16x1xf32>
    %67 = vector.broadcast %66 : vector<16x1xf32> to vector<16x16xf32>
    %68 = arith.divf %64, %67 : vector<16x16xf32>
    %cst_20 = arith.constant dense<0.000000e+00> : vector<16x8xf32>
    %69 = tpu.matmul %68, %57, %cst_20 {dimension_numbers = #tpu.dot_dimension_numbers<[1], [0], [0], [1], [0, 0, 1, 1], [], []>} : vector<16x16xf32>, vector<16x8xf32>, vector<16x8xf32> -> vector<16x8xf32>
    %70 = vector.extract_strided_slice %37 {offsets = [0, 16], sizes = [16, 8], strides = [1, 1]} : vector<16x32xf32> to vector<16x8xf32>
    %71 = vector.extract_strided_slice %38 {offsets = [0, 16], sizes = [16, 8], strides = [1, 1]} : vector<16x32xf32> to vector<16x8xf32>
    %72 = vector.extract_strided_slice %39 {offsets = [0, 16], sizes = [16, 8], strides = [1, 1]} : vector<16x32xf32> to vector<16x8xf32>
    %cst_21 = arith.constant dense<0.000000e+00> : vector<16x16xf32>
    %73 = tpu.matmul %70, %71, %cst_21 {dimension_numbers = #tpu.dot_dimension_numbers<[1], [1], [0], [0], [0, 0, 1, 0], [], []>} : vector<16x8xf32>, vector<16x8xf32>, vector<16x16xf32> -> vector<16x16xf32>
    %74 = arith.addf %73, %1 : vector<16x16xf32>
    %cst_22 = arith.constant dense<0xFF800000> : vector<16xf32>
    %75 = vector.multi_reduction <maximumf>, %74, %cst_22 [1] : vector<16x16xf32> to vector<16xf32>
    %76 = vector.shape_cast %75 : vector<16xf32> to vector<16x1xf32>
    %77 = vector.broadcast %76 : vector<16x1xf32> to vector<16x16xf32>
    %78 = arith.subf %74, %77 : vector<16x16xf32>
    %79 = math.exp %78 : vector<16x16xf32>
    %cst_23 = arith.constant dense<0.000000e+00> : vector<16xf32>
    %80 = vector.multi_reduction <add>, %79, %cst_23 [1] : vector<16x16xf32> to vector<16xf32>
    %81 = vector.shape_cast %80 : vector<16xf32> to vector<16x1xf32>
    %82 = vector.broadcast %81 : vector<16x1xf32> to vector<16x16xf32>
    %83 = arith.divf %79, %82 : vector<16x16xf32>
    %cst_24 = arith.constant dense<0.000000e+00> : vector<16x8xf32>
    %84 = tpu.matmul %83, %72, %cst_24 {dimension_numbers = #tpu.dot_dimension_numbers<[1], [0], [0], [1], [0, 0, 1, 1], [], []>} : vector<16x16xf32>, vector<16x8xf32>, vector<16x8xf32> -> vector<16x8xf32>
    %85 = vector.extract_strided_slice %37 {offsets = [0, 24], sizes = [16, 8], strides = [1, 1]} : vector<16x32xf32> to vector<16x8xf32>
    %86 = vector.extract_strided_slice %38 {offsets = [0, 24], sizes = [16, 8], strides = [1, 1]} : vector<16x32xf32> to vector<16x8xf32>
    %87 = vector.extract_strided_slice %39 {offsets = [0, 24], sizes = [16, 8], strides = [1, 1]} : vector<16x32xf32> to vector<16x8xf32>
    %cst_25 = arith.constant dense<0.000000e+00> : vector<16x16xf32>
    %88 = tpu.matmul %85, %86, %cst_25 {dimension_numbers = #tpu.dot_dimension_numbers<[1], [1], [0], [0], [0, 0, 1, 0], [], []>} : vector<16x8xf32>, vector<16x8xf32>, vector<16x16xf32> -> vector<16x16xf32>
    %89 = arith.addf %88, %1 : vector<16x16xf32>
    %cst_26 = arith.constant dense<0xFF800000> : vector<16xf32>
    %90 = vector.multi_reduction <maximumf>, %89, %cst_26 [1] : vector<16x16xf32> to vector<16xf32>
    %91 = vector.shape_cast %90 : vector<16xf32> to vector<16x1xf32>
    %92 = vector.broadcast %91 : vector<16x1xf32> to vector<16x16xf32>
    %93 = arith.subf %89, %92 : vector<16x16xf32>
    %94 = math.exp %93 : vector<16x16xf32>
    %cst_27 = arith.constant dense<0.000000e+00> : vector<16xf32>
    %95 = vector.multi_reduction <add>, %94, %cst_27 [1] : vector<16x16xf32> to vector<16xf32>
    %96 = vector.shape_cast %95 : vector<16xf32> to vector<16x1xf32>
    %97 = vector.broadcast %96 : vector<16x1xf32> to vector<16x16xf32>
    %98 = arith.divf %94, %97 : vector<16x16xf32>
    %cst_28 = arith.constant dense<0.000000e+00> : vector<16x8xf32>
    %99 = tpu.matmul %98, %87, %cst_28 {dimension_numbers = #tpu.dot_dimension_numbers<[1], [0], [0], [1], [0, 0, 1, 1], [], []>} : vector<16x16xf32>, vector<16x8xf32>, vector<16x8xf32> -> vector<16x8xf32>
    %100 = tpu.concatenate %54, %69, %84, %99 in 1 : vector<16x8xf32>, vector<16x8xf32>, vector<16x8xf32>, vector<16x8xf32> -> vector<16x32xf32>
    %cst_29 = arith.constant dense<0.000000e+00> : vector<16x32xf32>
    %101 = tpu.matmul %100, %34, %cst_29 {dimension_numbers = #tpu.dot_dimension_numbers<[1], [0], [0], [1], [0, 0, 1, 1], [], []>} : vector<16x32xf32>, vector<32x32xf32>, vector<16x32xf32> -> vector<16x32xf32>
    %102 = arith.addf %0, %101 : vector<16x32xf32>
    %cst_30 = arith.constant dense<0.000000e+00> : vector<16xf32>
    %103 = vector.multi_reduction <add>, %102, %cst_30 [1] : vector<16x32xf32> to vector<16xf32>
    %104 = vector.shape_cast %103 : vector<16xf32> to vector<16x1xf32>
    %cst_31 = arith.constant 3.200000e+01 : f32
    %105 = vector.broadcast %cst_31 : f32 to vector<16x1xf32>
    %106 = arith.divf %104, %105 : vector<16x1xf32>
    %107 = vector.broadcast %106 : vector<16x1xf32> to vector<16x32xf32>
    %108 = arith.subf %102, %107 : vector<16x32xf32>
    %109 = arith.mulf %108, %108 : vector<16x32xf32>
    %cst_32 = arith.constant dense<0.000000e+00> : vector<16xf32>
    %110 = vector.multi_reduction <add>, %109, %cst_32 [1] : vector<16x32xf32> to vector<16xf32>
    %111 = vector.shape_cast %110 : vector<16xf32> to vector<16x1xf32>
    %cst_33 = arith.constant 0.0322580636 : f32
    %112 = vector.broadcast %cst_33 : f32 to vector<16x1xf32>
    %113 = arith.mulf %111, %112 : vector<16x1xf32>
    %114 = math.sqrt %113 : vector<16x1xf32>
    %115 = vector.broadcast %5 : vector<1x32xf32> to vector<16x32xf32>
    %116 = arith.mulf %115, %108 : vector<16x32xf32>
    %cst_34 = arith.constant 9.99999997E-7 : f32
    %117 = vector.broadcast %cst_34 : f32 to vector<16x1xf32>
    %118 = arith.addf %114, %117 : vector<16x1xf32>
    %119 = vector.broadcast %118 : vector<16x1xf32> to vector<16x32xf32>
    %120 = arith.divf %116, %119 : vector<16x32xf32>
    %121 = vector.broadcast %6 : vector<1x32xf32> to vector<16x32xf32>
    %122 = arith.addf %120, %121 : vector<16x32xf32>
    %c0_35 = arith.constant 0 : index
    %c0_36 = arith.constant 0 : index
    %123 = vector.load %arg4[%c0_35, %c0_36] : memref<32x64xf32, #tpu.memory_space<vmem>>, vector<32x64xf32>
    %cst_37 = arith.constant dense<0.000000e+00> : vector<16x64xf32>
    %124 = tpu.matmul %122, %123, %cst_37 {dimension_numbers = #tpu.dot_dimension_numbers<[1], [0], [0], [1], [0, 0, 1, 1], [], []>} : vector<16x32xf32>, vector<32x64xf32>, vector<16x64xf32> -> vector<16x64xf32>
    %125 = vector.broadcast %9 : vector<1x64xf32> to vector<16x64xf32>
    %126 = arith.addf %124, %125 : vector<16x64xf32>
    %cst_38 = arith.constant 0.000000e+00 : f32
    %127 = vector.broadcast %cst_38 : f32 to vector<16x64xf32>
    %128 = arith.maximumf %126, %127 : vector<16x64xf32>
    %c0_39 = arith.constant 0 : index
    %c0_40 = arith.constant 0 : index
    %129 = vector.load %arg5[%c0_39, %c0_40] : memref<64x32xf32, #tpu.memory_space<vmem>>, vector<64x32xf32>
    %cst_41 = arith.constant dense<0.000000e+00> : vector<16x32xf32>
    %130 = tpu.matmul %128, %129, %cst_41 {dimension_numbers = #tpu.dot_dimension_numbers<[1], [0], [0], [1], [0, 0, 1, 1], [], []>} : vector<16x64xf32>, vector<64x32xf32>, vector<16x32xf32> -> vector<16x32xf32>
    %131 = arith.addf %102, %130 : vector<16x32xf32>
    %132 = vector.broadcast %10 : vector<1x32xf32> to vector<16x32xf32>
    %133 = arith.addf %131, %132 : vector<16x32xf32>
    %cst_42 = arith.constant dense<0.000000e+00> : vector<16xf32>
    %134 = vector.multi_reduction <add>, %133, %cst_42 [1] : vector<16x32xf32> to vector<16xf32>
    %135 = vector.shape_cast %134 : vector<16xf32> to vector<16x1xf32>
    %cst_43 = arith.constant 3.200000e+01 : f32
    %136 = vector.broadcast %cst_43 : f32 to vector<16x1xf32>
    %137 = arith.divf %135, %136 : vector<16x1xf32>
    %138 = vector.broadcast %137 : vector<16x1xf32> to vector<16x32xf32>
    %139 = arith.subf %133, %138 : vector<16x32xf32>
    %140 = arith.mulf %139, %139 : vector<16x32xf32>
    %cst_44 = arith.constant dense<0.000000e+00> : vector<16xf32>
    %141 = vector.multi_reduction <add>, %140, %cst_44 [1] : vector<16x32xf32> to vector<16xf32>
    %142 = vector.shape_cast %141 : vector<16xf32> to vector<16x1xf32>
    %cst_45 = arith.constant 0.0322580636 : f32
    %143 = vector.broadcast %cst_45 : f32 to vector<16x1xf32>
    %144 = arith.mulf %142, %143 : vector<16x1xf32>
    %145 = math.sqrt %144 : vector<16x1xf32>
    %146 = vector.broadcast %7 : vector<1x32xf32> to vector<16x32xf32>
    %147 = arith.mulf %146, %139 : vector<16x32xf32>
    %cst_46 = arith.constant 9.99999997E-7 : f32
    %148 = vector.broadcast %cst_46 : f32 to vector<16x1xf32>
    %149 = arith.addf %145, %148 : vector<16x1xf32>
    %150 = vector.broadcast %149 : vector<16x1xf32> to vector<16x32xf32>
    %151 = arith.divf %147, %150 : vector<16x32xf32>
    %152 = vector.broadcast %8 : vector<1x32xf32> to vector<16x32xf32>
    %153 = arith.addf %151, %152 : vector<16x32xf32>
    %c0_47 = arith.constant 0 : index
    %c0_48 = arith.constant 0 : index
    %154 = vector.load %arg6[%c0_47, %c0_48] : memref<16x32xf32, #tpu.memory_space<vmem>>, vector<16x32xf32>
    tpu.vector_store %arg6[%c0_47, %c0_48], %153 {strides = array<i32>} : memref<16x32xf32, #tpu.memory_space<vmem>>, vector<16x32xf32>,
    return
  }
}

</mosaic_0001>

<bundles_post_ra>
// kernel: tpu_custom_call.1
= control target key start
LH: loop header
LB: loop body
LE: loop exit
PB: predicated region body
PF: predicated region fallthrough
CT: control target
= control target key end

     0   :  { %11 = vsyncpa [#allocation3], 0  ;;  %s2061_s0 = inlined_call_operand.vmem [shape: f32[16,32], index: 0, kind: input, shape index: {}]   ;;  %s2062_s1 = inlined_call_operand.vmem [shape: f32[16,16], index: 1, kind: input, shape index: {}]   ;;  %s2063_s2 = inlined_call_operand.hbm [shape: f32[8,128], index: 2, kind: input, shape index: {}]   ;;  %s2064_s3 = inlined_call_operand.vmem [shape: f32[32,128], index: 3, kind: input, shape index: {}]   ;;  %s2065_s4 = inlined_call_operand.vmem [shape: f32[32,64], index: 4, kind: input, shape index: {}]   ;;  %s2066_s5 = inlined_call_operand.vmem [shape: f32[64,32], index: 5, kind: input, shape index: {}]   ;;  %s2067_s6 = inlined_call_operand.hbm [shape: f32[16,32], index: 6, kind: output, shape index: {}]  }
   0x1   :  { %12 = vsyncpa [#allocation4], 0  ;;  %s1744_s21 = smov [#allocation2]  }
   0x2   :  { %s23_s22 = sshll.u32 %s1744_s21, 4  ;;  %s24_s22 = int_to_ptr.vmem [resolvable:$true] %s23_s22 }
   0x3   :  { %s1708_s23 = scalar_lea.vmem %s24_s22, 128  ;;  %p1713_p1 = scmp.lt.s32.totalorder %s24_s22, %s24_s22 }
   0x4   :  { %p1709_p0 = scmp.ne.s32.totalorder %s24_s22, %s1708_s23  ;;  %p1714_p2 = scmp.lt.s32.totalorder %s1708_s23, %s1708_s23 }
   0x6   :  { %p1715_p3 = por %p1714_p2, %p1713_p1 }
   0x8   :  { %p1716_p4 = pnand %p1715_p3, %p1709_p0 }
   0xa   :  { %1719 = shalt.err (!%p1716_p4)
}
   0xb   :  { %26 = dma.hbm_to_vmem [thread:$0]  %s2063_s2, 128, %s24_s22, [#allocation3]  }
   0xc   :  { %1740 = dma.done.wait [#allocation3], 128  }
   0xd   :  { %1741 = vsyncadd [#allocation3], 4294967168  ;;  %vm41_vm0 = vcmask 261120   ;;  %v1803_v0 = vld [vmem:[%s2061_s0] sm:$0xff]  ;;  %v1808_v1 = vld [vmem:[%s2061_s0 + $0x8] sm:$0xff]  ;;  %v77_v25 = vlaneseq  ;;  %vm188_vm5 = vcmask 64512  }
   0xe   :  { %v42_v2 = vsel %vm41_vm0, %v1803_v0, 0.0  ;;  %v45_v3 = vsel %vm41_vm0, %v1808_v1, 0.0  ;;  %v1821_v14 = vld [vmem:[%s2064_s3 + $0x18] sm:$0xff]  ;;  %v1826_v15 = vld [vmem:[%s2064_s3 + $0x10] sm:$0xff]  ;;  %v1833_v16 = vld [vmem:[%s2064_s3 + $0x8] sm:$0xff]  ;;  %s1746_s12 = smov 120  }
   0xf   :  { %43 = vadd.xlane.f32.xlu0 %v42_v2  ;;  %1518 = vmatprep.subr.mxu1 %v1821_v14  ;;  %v1842_v17 = vld [vmem:[%s2064_s3] sm:$0xff]  ;;  %v1846_v32 = vshrl.u32 %v77_v25, 7  ;;  %s1745_s3 = smov 96   ;;  %s1747_s13 = smov 88   ;;  %v1889_v59 = vld [vmem:[%s2062_s1 + $0x8] sm:$0xff]  ;;  %vm274_vm6 = vcmask 130048  }
  0x10   :  { %1519 = vmatpush3.msra.mxu1 %v1821_v14  ;;  %v1849_v37 = vld [vmem:[#allocation2] sm:$0xff]  ;;  %s1749_s18 = smov 56   ;;  %s1750_s19 = smov 80   ;;  %vm1012_vm7 = vcmask 195584   ;;  %vm1265_vm12 = vcmask 523264  }
  0x11   :  { %1520 = vmatprep.subr.mxu1 %v1826_v15  ;;  %v79_v36 = vsub.s32 0, %v1846_v32  ;;  %v91_v39 = vsub.s32 1, %v1846_v32  ;;  %v1894_v61 = vld [vmem:[%s2062_s1] sm:$0xff]  ;;  %s1748_s1 = smov 64   ;;  %s1751_s20 = smov 112  }
  0x12   :  { %1521 = vmatpush3.msra.mxu1 %v1826_v15  ;;  %s1752_s21 = smov 48   ;;  %s1753_s22 = smov 72  }
  0x13   :  { %46 = vadd.xlane.f32.xlu0 %v45_v3  ;;  %1522 = vmatprep.subr.mxu1 %v1833_v16  ;;  %v80_v38 = vrot.slane %v1849_v37, %v79_v36  ;;  %v92_v41 = vrot.slane %v1849_v37, %v91_v39  ;;  %s1754_s23 = smov 104   ;;  %s1755_s24 = smov 40  }
  0x14   :  { %1523 = vmatpush3.msra.mxu1 %v1833_v16  ;;  %s1756_s25 = smov 32   ;;  %s1757_s26 = smov 16  }
  0x15   :  { %1524 = vmatprep.subr.mxu1 %v1842_v17  ;;  %s1758_s27 = smov 8   ;;  %s1759_s28 = smov 24  }
  0x16   :  { %1525 = vmatpush3.msra.mxu1 %v1842_v17 }
  0x98   :  { %v44_v4 = vpop.xlane.xlu0 %43 }
  0x99   :  { %v49_v5 = vmul.f32 0.03125, %v44_v4 }
  0x9b   :  { %v51_v6 = vsub.f32 %v1803_v0, %v49_v5 }
  0x9c   :  { %v47_v7 = vpop.xlane.xlu0 %46 }
  0x9d   :  { %v50_v8 = vmul.f32 0.03125, %v47_v7  ;;  %v53_v9 = vmul.f32 %v51_v6, %v51_v6  ;;  %v81_v40 = vmul.f32 %v80_v38, %v51_v6 }
  0x9f   :  { %v52_v10 = vsub.f32 %v1808_v1, %v50_v8  ;;  %v55_v11 = vsel %vm41_vm0, %v53_v9, 0.0 }
  0xa0   :  { %56 = vadd.xlane.f32.xlu1 %v55_v11 }
  0xa1   :  { %v54_v12 = vmul.f32 %v52_v10, %v52_v10  ;;  %v82_v44 = vmul.f32 %v80_v38, %v52_v10 }
  0xa3   :  { %v58_v13 = vsel %vm41_vm0, %v54_v12, 0.0 }
  0xa4   :  { %59 = vadd.xlane.f32.xlu1 %v58_v13 }
 0x129   :  { %v57_v18 = vpop.xlane.xlu1 %56 }
 0x12a   :  { %v61_v19 = vmul.f32 0.032258064, %v57_v18 }
 0x12c   :  { %1644 = vrsqrt.f32 %v61_v19  ;;  %vm65_vm1 = vcmp.eq.f32.partialorder %v61_v19, inf  ;;  %v68_v24 = vand.u32 2147483648, %v61_v19  ;;  %vm67_vm2 = vcmp.eq.f32.partialorder %v61_v19, 0.0 }
 0x12d   :  { %v60_v20 = vpop.xlane.xlu1 %59 }
 0x12e   :  { %v62_v21 = vmul.f32 0.032258064, %v60_v20 }
 0x130   :  { %1646 = vrsqrt.f32 %v62_v21  ;;  %vm72_vm3 = vcmp.eq.f32.partialorder %v62_v21, inf  ;;  %v75_v31 = vand.u32 2147483648, %v62_v21  ;;  %vm74_vm4 = vcmp.eq.f32.partialorder %v62_v21, 0.0 }
 0x139   :  { %v1645_v22 = vpop.eup %1644 }
 0x13a   :  { %v64_v23 = vmul.f32 %v1645_v22, %v61_v19 }
 0x13c   :  { %v66_v26 = vsel %vm65_vm1, %v61_v19, %v64_v23 }
 0x13d   :  { %v1647_v27 = vpop.eup %1646  ;;  %v69_v28 = vsel %vm67_vm2, %v68_v24, %v66_v26 }
 0x13e   :  { %v71_v29 = vmul.f32 %v1647_v27, %v62_v21  ;;  %v83_v30 = vadd.f32 1e-06, %v69_v28 }
 0x140   :  { %v73_v33 = vsel %vm72_vm3, %v62_v21, %v71_v29  ;;  %1648 = vrcp.f32 %v83_v30 }
 0x141   :  { %v76_v34 = vsel %vm74_vm4, %v75_v31, %v73_v33 }
 0x142   :  { %v84_v35 = vadd.f32 1e-06, %v76_v34 }
 0x144   :  { %1650 = vrcp.f32 %v84_v35 }
 0x14d   :  { %v1649_v42 = vpop.eup %1648 }
 0x14e   :  { %v86_v43 = vmul.f32 %v1649_v42, %v81_v40 }
 0x150   :  { %v93_v45 = vadd.f32 %v92_v41, %v86_v43 }
 0x151   :  { %v1651_v46 = vpop.eup %1650 }
 0x152   :  { %v88_v47 = vmul.f32 %v1651_v46, %v82_v44  ;;  %1526 = vmatprep.mubr.msk.f32.mxu1 %vm41_vm0, %v93_v45 }
 0x154   :  { %v94_v48 = vadd.f32 %v92_v41, %v88_v47 }
 0x156   :  { %1527 = vmatmul.mubr.msk.f32.vlgmr.msra.gmra.mxu1 %vm41_vm0, %v94_v48 }
 0x216   :  { %v1856_v49 = vpop.f32.mrf.mxu1 }
 0x217   :  { %186 = vrot.lane.b32.xlu0 %v1856_v49, %s1745_s3  ;;  %v1871_v52 = vmul.f32 0.35355338, %v1856_v49 }
 0x218   :  { %v1859_v50 = vpop.f32.mrf.mxu1 }
 0x219   :  { %184 = vrot.lane.b32.xlu1 %v1859_v50, %s1745_s3  ;;  %v1863_v51 = vmul.f32 0.35355338, %v1859_v50 }
 0x21b   :  { %384 = vrot.lane.b32.xlu0 %v1863_v51, %s1746_s12  ;;  %1533 = vmatprep.mubr.msk.f32.mxu1 %vm188_vm5, %v1863_v51 }
 0x21d   :  { %390 = vrot.lane.b32.xlu1 %v1856_v49, %s1747_s13 }
 0x221   :  { %388 = vrot.lane.b32.xlu1 %v1859_v50, %s1747_s13 }
 0x225   :  { %386 = vrot.lane.b32.xlu1 %v1871_v52, %s1746_s12 }
 0x289   :  { %v187_v53 = vpop.permute.xlu0 %186 }
 0x28a   :  { %1529 = vmatprep.subr.msk.mxu1 %vm188_vm5, %v187_v53 }
 0x28b   :  { %1530 = vmatpush3.xpose.msk.msra.mxu1 %vm188_vm5, %v187_v53  ;;  %v185_v54 = vpop.permute.xlu1 %184 }
 0x28c   :  { %1531 = vmatprep.subr.msk.mxu1 %vm188_vm5, %v185_v54 }
 0x28d   :  { %v385_v56 = vpop.permute.xlu0 %384 }
 0x28f   :  { %1532 = vmatpush3.xpose.msk.msra.mxu1 %vm188_vm5, %v185_v54  ;;  %v391_v55 = vpop.permute.xlu1 %390 }
 0x290   :  { %1543 = vmatprep.subr.msk.mxu1 %vm188_vm5, %v391_v55 }
 0x292   :  { %1534 = vmatmul.mubr.msk.f32.vlgmr.msra.gmra.mxu1 %vm188_vm5, %v1871_v52 }
 0x293   :  { %v389_v57 = vpop.permute.xlu1 %388  ;;  %1544 = vmatpush3.xpose.msk.msra.mxu1 %vm188_vm5, %v391_v55  ;;  %1547 = vmatprep.mubr.msk.f32.mxu1 %vm188_vm5, %v385_v56 }
 0x294   :  { %1545 = vmatprep.subr.msk.mxu1 %vm188_vm5, %v389_v57 }
 0x297   :  { %1546 = vmatpush3.xpose.msk.msra.mxu1 %vm188_vm5, %v389_v57  ;;  %v387_v58 = vpop.permute.xlu1 %386 }
 0x29a   :  { %1548 = vmatmul.mubr.msk.f32.vlgmr.msra.gmra.mxu1 %vm188_vm5, %v387_v58 }
 0x352   :  { %v1535_v60 = vpop.f32.mrf.mxu1 }
 0x353   :  { %v271_v62 = vadd.f32 %v1535_v60, %v1889_v59 }
 0x354   :  { %v265_v63 = vpop.f32.mrf.mxu1 }
 0x355   :  { %v266_v2 = vadd.f32 %v265_v63, %v1894_v61  ;;  %v278_v3 = vsel %vm274_vm6, %v271_v62, -inf }
 0x356   :  { %279 = vmax.xlane.f32.xlu1 %v278_v3 }
 0x357   :  { %v275_v4 = vsel %vm274_vm6, %v266_v2, -inf }
 0x358   :  { %276 = vmax.xlane.f32.xlu0 %v275_v4 }
 0x35a   :  { %v1549_v5 = vpop.f32.mrf.mxu1 }
 0x35b   :  { %v472_v8 = vadd.f32 %v1549_v5, %v1889_v59 }
 0x35c   :  { %v466_v6 = vpop.f32.mrf.mxu1 }
 0x35d   :  { %v467_v7 = vadd.f32 %v466_v6, %v1894_v61  ;;  %v478_v10 = vsel %vm274_vm6, %v472_v8, -inf }
 0x35f   :  { %v475_v9 = vsel %vm274_vm6, %v467_v7, -inf }
 0x360   :  { %476 = vmax.xlane.f32.xlu0 %v475_v9 }
 0x364   :  { %479 = vmax.xlane.f32.xlu0 %v478_v10 }
 0x367   :  { %297 = vrot.lane.b32.xlu1 %v1859_v50, %s1748_s1 }
 0x36b   :  { %499 = vrot.lane.b32.xlu1 %v1856_v49, %s1749_s18 }
 0x36f   :  { %497 = vrot.lane.b32.xlu1 %v1859_v50, %s1749_s18 }
 0x37a   :  { %299 = vrot.lane.b32.xlu0 %v1856_v49, %s1748_s1 }
 0x3df   :  { %v280_v11 = vpop.xlane.xlu1 %279 }
 0x3e0   :  { %v282_v12 = vsub.f32 %v271_v62, %v280_v11 }
 0x3e1   :  { %v277_v13 = vpop.xlane.xlu0 %276 }
 0x3e2   :  { %v285_v18 = vmul.f32 1.442695, %v282_v12  ;;  %v281_v19 = vsub.f32 %v266_v2, %v277_v13 }
 0x3e3   :  { %v298_v26 = vpop.permute.xlu1 %297 }
 0x3e4   :  { %1652 = vpow2.f32 %v285_v18  ;;  %v283_v20 = vmul.f32 1.442695, %v281_v19 }
 0x3e6   :  { %1654 = vpow2.f32 %v283_v20 }
 0x3e7   :  { %v500_v34 = vpop.permute.xlu1 %499 }
 0x3e9   :  { %v477_v21 = vpop.xlane.xlu0 %476 }
 0x3ea   :  { %v481_v22 = vsub.f32 %v467_v7, %v477_v21 }
 0x3eb   :  { %v498_v40 = vpop.permute.xlu1 %497 }
 0x3ec   :  { %v483_v23 = vmul.f32 1.442695, %v481_v22 }
 0x3ed   :  { %v480_v24 = vpop.xlane.xlu0 %479 }
 0x3ee   :  { %1656 = vpow2.f32 %v483_v23  ;;  %v482_v25 = vsub.f32 %v472_v8, %v480_v24 }
 0x3f0   :  { %v485_v27 = vmul.f32 1.442695, %v482_v25 }
 0x3f1   :  { %v1653_v28 = vpop.eup %1652  ;;  %v300_v29 = vpop.permute.xlu0 %299 }
 0x3f2   :  { %1658 = vpow2.f32 %v485_v27  ;;  %1536 = vmatprep.subr.mxu0 %v300_v29  ;;  %v290_v30 = vsel %vm274_vm6, %v1653_v28, 0.0 }
 0x3f3   :  { %v1655_v31 = vpop.eup %1654  ;;  %291 = vadd.xlane.f32.xlu1 %v290_v30  ;;  %1537 = vmatpush3.msra.mxu0 %v300_v29 }
 0x3f4   :  { %1538 = vmatprep.subr.mxu0 %v298_v26  ;;  %v287_v33 = vsel %vm274_vm6, %v1655_v31, 0.0 }
 0x3f5   :  { %288 = vadd.xlane.f32.xlu0 %v287_v33  ;;  %1539 = vmatpush3.msra.mxu0 %v298_v26 }
 0x3f6   :  { %1550 = vmatprep.subr.mxu0 %v500_v34 }
 0x3fb   :  { %v1657_v35 = vpop.eup %1656 }
 0x3fc   :  { %v487_v36 = vsel %vm274_vm6, %v1657_v35, 0.0 }
 0x3fd   :  { %488 = vadd.xlane.f32.xlu0 %v487_v36 }
 0x3ff   :  { %v1659_v38 = vpop.eup %1658 }
 0x400   :  { %v490_v39 = vsel %vm274_vm6, %v1659_v38, 0.0 }
 0x401   :  { %491 = vadd.xlane.f32.xlu1 %v490_v39 }
 0x412   :  { %588 = vrot.lane.b32.xlu1 %v1859_v50, %s1750_s19 }
 0x413   :  { %590 = vrot.lane.b32.xlu0 %v1856_v49, %s1750_s19 }
 0x416   :  { %586 = vrot.lane.b32.xlu1 %v1871_v52, %s1751_s20 }
 0x417   :  { %584 = vrot.lane.b32.xlu0 %v1863_v51, %s1751_s20 }
 0x47c   :  { %v292_v41 = vpop.xlane.xlu1 %291 }
 0x47d   :  { %1660 = vrcp.f32 %v292_v41 }
 0x47e   :  { %v289_v42 = vpop.xlane.xlu0 %288 }
 0x47f   :  { %1662 = vrcp.f32 %v289_v42 }
 0x486   :  { %v489_v43 = vpop.xlane.xlu0 %488 }
 0x487   :  { %1664 = vrcp.f32 %v489_v43 }
 0x48a   :  { %v492_v44 = vpop.xlane.xlu1 %491  ;;  %v1661_v45 = vpop.eup %1660 }
 0x48b   :  { %1666 = vrcp.f32 %v492_v44  ;;  %v296_v48 = vmul.f32 %v1661_v45, %v1653_v28  ;;  %v591_v53 = vpop.permute.xlu0 %590 }
 0x48c   :  { %v1663_v46 = vpop.eup %1662 }
 0x48d   :  { %v294_v47 = vmul.f32 %v1663_v46, %v1655_v31 }
 0x48e   :  { %v589_v60 = vpop.permute.xlu1 %588 }
 0x48f   :  { %1540 = vmatprep.mubr.msk.f32.mxu0 %vm274_vm6, %v294_v47  ;;  %v585_v58 = vpop.permute.xlu0 %584 }
 0x490   :  { %1541 = vmatmul.mubr.msk.f32.vlgmr.msra.gmra.mxu0 %vm274_vm6, %v296_v48 }
 0x491   :  { %1551 = vmatpush3.msra.mxu0 %v500_v34 }
 0x492   :  { %1552 = vmatprep.subr.mxu0 %v498_v40  ;;  %v587_v62 = vpop.permute.xlu1 %586 }
 0x493   :  { %1553 = vmatpush3.msra.mxu0 %v498_v40 }
 0x494   :  { %v1665_v54 = vpop.eup %1664  ;;  %1557 = vmatprep.subr.msk.mxu0 %vm188_vm5, %v591_v53 }
 0x495   :  { %v494_v55 = vmul.f32 %v1665_v54, %v1657_v35 }
 0x497   :  { %1554 = vmatprep.mubr.msk.f32.mxu0 %vm274_vm6, %v494_v55 }
 0x498   :  { %v1667_v56 = vpop.eup %1666 }
 0x499   :  { %v496_v57 = vmul.f32 %v1667_v56, %v1659_v38 }
 0x49b   :  { %1555 = vmatmul.mubr.msk.f32.vlgmr.msra.gmra.mxu0 %vm274_vm6, %v496_v57 }
 0x49c   :  { %1558 = vmatpush3.xpose.msk.msra.mxu0 %vm188_vm5, %v591_v53  ;;  %1561 = vmatprep.mubr.msk.f32.mxu0 %vm188_vm5, %v585_v58 }
 0x49d   :  { %1559 = vmatprep.subr.msk.mxu0 %vm188_vm5, %v589_v60 }
 0x4a0   :  { %1560 = vmatpush3.xpose.msk.msra.mxu0 %vm188_vm5, %v589_v60 }
 0x4a3   :  { %1562 = vmatmul.mubr.msk.f32.vlgmr.msra.gmra.mxu0 %vm188_vm5, %v587_v62 }
 0x550   :  { %v1926_v63 = vpop.f32.mrf.mxu0 }
 0x552   :  { %v1928_v2 = vpop.f32.mrf.mxu0 }
 0x55b   :  { %v1930_v3 = vpop.f32.mrf.mxu0 }
 0x55d   :  { %v1932_v4 = vpop.f32.mrf.mxu0 }
 0x563   :  { %v1563_v5 = vpop.f32.mrf.mxu0 }
 0x564   :  { %v672_v6 = vadd.f32 %v1563_v5, %v1889_v59 }
 0x565   :  { %v666_v7 = vpop.f32.mrf.mxu0 }
 0x566   :  { %v667_v8 = vadd.f32 %v666_v7, %v1894_v61  ;;  %v678_v9 = vsel %vm274_vm6, %v672_v6, -inf }
 0x567   :  { %679 = vmax.xlane.f32.xlu1 %v678_v9 }
 0x568   :  { %v675_v10 = vsel %vm274_vm6, %v667_v8, -inf }
 0x569   :  { %676 = vmax.xlane.f32.xlu0 %v675_v10 }
 0x578   :  { %697 = vrot.lane.b32.xlu1 %v1859_v50, %s1752_s21 }
 0x57c   :  { %790 = vrot.lane.b32.xlu1 %v1856_v49, %s1753_s22 }
 0x580   :  { %788 = vrot.lane.b32.xlu1 %v1859_v50, %s1753_s22 }
 0x584   :  { %786 = vrot.lane.b32.xlu1 %v1871_v52, %s1754_s23 }
 0x5f0   :  { %v680_v11 = vpop.xlane.xlu1 %679 }
 0x5f1   :  { %v682_v12 = vsub.f32 %v672_v6, %v680_v11 }
 0x5f2   :  { %v677_v13 = vpop.xlane.xlu0 %676 }
 0x5f3   :  { %v685_v18 = vmul.f32 1.442695, %v682_v12  ;;  %v681_v19 = vsub.f32 %v667_v8, %v677_v13 }
 0x5f4   :  { %v698_v26 = vpop.permute.xlu1 %697 }
 0x5f5   :  { %1668 = vpow2.f32 %v685_v18  ;;  %v683_v20 = vmul.f32 1.442695, %v681_v19 }
 0x5f7   :  { %1670 = vpow2.f32 %v683_v20 }
 0x5f8   :  { %v791_v28 = vpop.permute.xlu1 %790 }
 0x5fc   :  { %v789_v34 = vpop.permute.xlu1 %788 }
 0x600   :  { %v787_v35 = vpop.permute.xlu1 %786 }
 0x602   :  { %v1669_v21 = vpop.eup %1668 }
 0x603   :  { %v690_v22 = vsel %vm274_vm6, %v1669_v21, 0.0 }
 0x604   :  { %v1671_v23 = vpop.eup %1670  ;;  %691 = vadd.xlane.f32.xlu0 %v690_v22 }
 0x605   :  { %v687_v24 = vsel %vm274_vm6, %v1671_v23, 0.0 }
 0x608   :  { %688 = vadd.xlane.f32.xlu0 %v687_v24 }
 0x61e   :  { %699 = vrot.lane.b32.xlu0 %v1856_v49, %s1752_s21 }
 0x622   :  { %784 = vrot.lane.b32.xlu0 %v1863_v51, %s1754_s23 }
 0x68d   :  { %v692_v52 = vpop.xlane.xlu0 %691 }
 0x68e   :  { %1672 = vrcp.f32 %v692_v52 }
 0x691   :  { %v689_v25 = vpop.xlane.xlu0 %688 }
 0x692   :  { %1674 = vrcp.f32 %v689_v25 }
 0x695   :  { %v700_v27 = vpop.permute.xlu0 %699 }
 0x696   :  { %1564 = vmatprep.subr.mxu1 %v700_v27 }
 0x697   :  { %1565 = vmatpush3.msra.mxu1 %v700_v27 }
 0x698   :  { %1566 = vmatprep.subr.mxu1 %v698_v26 }
 0x699   :  { %1567 = vmatpush3.msra.mxu1 %v698_v26  ;;  %v785_v51 = vpop.permute.xlu0 %784 }
 0x69a   :  { %1571 = vmatprep.subr.msk.mxu1 %vm188_vm5, %v791_v28 }
 0x69b   :  { %v1673_v29 = vpop.eup %1672 }
 0x69c   :  { %v696_v33 = vmul.f32 %v1673_v29, %v1669_v21 }
 0x69f   :  { %v1675_v30 = vpop.eup %1674 }
 0x6a0   :  { %v694_v31 = vmul.f32 %v1675_v30, %v1671_v23 }
 0x6a2   :  { %1568 = vmatprep.mubr.msk.f32.mxu1 %vm274_vm6, %v694_v31 }
 0x6a3   :  { %1569 = vmatmul.mubr.msk.f32.vlgmr.msra.gmra.mxu1 %vm274_vm6, %v696_v33 }
 0x6a4   :  { %1572 = vmatpush3.xpose.msk.msra.mxu1 %vm188_vm5, %v791_v28  ;;  %1575 = vmatprep.mubr.msk.f32.mxu1 %vm188_vm5, %v785_v51 }
 0x6a5   :  { %1573 = vmatprep.subr.msk.mxu1 %vm188_vm5, %v789_v34 }
 0x6a8   :  { %1574 = vmatpush3.xpose.msk.msra.mxu1 %vm188_vm5, %v789_v34  ;;  %v1169_v34 = vld [vmem:[%s2065_s4 + $0x18] sm:$0xff] }
 0x6a9   :  { %1596 = vmatprep.subr.mxu1 %v1169_v34 }
 0x6ab   :  { %1576 = vmatmul.mubr.msk.f32.vlgmr.msra.gmra.mxu1 %vm188_vm5, %v787_v35  ;;  %v1168_v35 = vld [vmem:[%s2065_s4 + $0x10] sm:$0xff] }
 0x6ac   :  { %1597 = vmatpush3.msra.mxu1 %v1169_v34 }
 0x6ad   :  { %1598 = vmatprep.subr.mxu1 %v1168_v35 }
 0x6ae   :  { %1599 = vmatpush3.msra.mxu1 %v1168_v35 }
 0x763   :  { %v1570_v36 = vpop.f32.mrf.mxu1 }
 0x765   :  { %v775_v38 = vpop.f32.mrf.mxu1 }
 0x76b   :  { %v1577_v39 = vpop.f32.mrf.mxu1 }
 0x76c   :  { %v872_v40 = vadd.f32 %v1577_v39, %v1889_v59  ;;  %v1264_v39 = vld [vmem:[%s2066_s5 + $0x38] sm:$0xff] }
 0x76d   :  { %v866_v41 = vpop.f32.mrf.mxu1 }
 0x76e   :  { %v867_v42 = vadd.f32 %v866_v41, %v1894_v61  ;;  %v878_v43 = vsel %vm274_vm6, %v872_v40, -inf  ;;  %v1262_v41 = vld [vmem:[%s2066_s5 + $0x28] sm:$0xff] }
 0x76f   :  { %879 = vmax.xlane.f32.xlu1 %v878_v43 }
 0x770   :  { %v875_v44 = vsel %vm274_vm6, %v867_v42, -inf }
 0x771   :  { %876 = vmax.xlane.f32.xlu0 %v875_v44 }
 0x780   :  { %897 = vrot.lane.b32.xlu1 %v1859_v50, %s1755_s24 }
 0x784   :  { %1025 = vrot.lane.b32.xlu1 %v1821_v14, %s1756_s25 }
 0x788   :  { %1023 = vrot.lane.b32.xlu1 %v1826_v15, %s1756_s25 }
 0x78c   :  { %1021 = vrot.lane.b32.xlu1 %v1833_v16, %s1756_s25 }
 0x790   :  { %994 = vrot.lane.b32.xlu1 %v775_v38, %s1757_s26  ;;  %v1166_v38 = vld [vmem:[%s2065_s4] sm:$0xff] }
 0x7f8   :  { %v880_v59 = vpop.xlane.xlu1 %879 }
 0x7f9   :  { %v882_v61 = vsub.f32 %v872_v40, %v880_v59  ;;  %v1263_v40 = vld [vmem:[%s2066_s5 + $0x30] sm:$0xff] }
 0x7fa   :  { %v877_v45 = vpop.xlane.xlu0 %876 }
 0x7fb   :  { %v885_v46 = vmul.f32 1.442695, %v882_v61  ;;  %v881_v47 = vsub.f32 %v867_v42, %v877_v45  ;;  %v1261_v42 = vld [vmem:[%s2066_s5 + $0x20] sm:$0xff] }
 0x7fc   :  { %v898_v55 = vpop.permute.xlu1 %897 }
 0x7fd   :  { %1676 = vpow2.f32 %v885_v46  ;;  %v883_v48 = vmul.f32 1.442695, %v881_v47 }
 0x7ff   :  { %1678 = vpow2.f32 %v883_v48 }
 0x80a   :  { %v1677_v53 = vpop.eup %1676 }
 0x80b   :  { %v890_v50 = vsel %vm274_vm6, %v1677_v53, 0.0 }
 0x80c   :  { %v1679_v54 = vpop.eup %1678  ;;  %891 = vadd.xlane.f32.xlu0 %v890_v50 }
 0x80d   :  { %v887_v14 = vsel %vm274_vm6, %v1679_v54, 0.0 }
 0x810   :  { %888 = vadd.xlane.f32.xlu0 %v887_v14 }
 0x826   :  { %899 = vrot.lane.b32.xlu0 %v1856_v49, %s1755_s24  ;;  %v1026_v49 = vpop.permute.xlu1 %1025 }
 0x82a   :  { %986 = vrot.lane.b32.xlu0 %v1932_v4, %s1758_s27  ;;  %v1024_v60 = vpop.permute.xlu1 %1023 }
 0x82e   :  { %988 = vrot.lane.b32.xlu0 %v1930_v3, %s1758_s27 }
 0x832   :  { %996 = vrot.lane.b32.xlu0 %v1570_v36, %s1757_s26  ;;  %v1167_v36 = vld [vmem:[%s2065_s4 + $0x8] sm:$0xff] }
 0x833   :  { %1600 = vmatprep.subr.mxu1 %v1167_v36 }
 0x834   :  { %1601 = vmatpush3.msra.mxu1 %v1167_v36 }
 0x835   :  { %1602 = vmatprep.subr.mxu1 %v1166_v38 }
 0x836   :  { %1019 = vrot.lane.b32.xlu0 %v1842_v17, %s1756_s25  ;;  %v1022_v17 = vpop.permute.xlu1 %1021  ;;  %1603 = vmatpush3.msra.mxu1 %v1166_v38 }
 0x83a   :  { %v995_v10 = vpop.permute.xlu1 %994 }
 0x895   :  { %v892_v15 = vpop.xlane.xlu0 %891 }
 0x896   :  { %1680 = vrcp.f32 %v892_v15 }
 0x899   :  { %v889_v16 = vpop.xlane.xlu0 %888 }
 0x89a   :  { %1682 = vrcp.f32 %v889_v16 }
 0x89d   :  { %v900_v56 = vpop.permute.xlu0 %899 }
 0x89e   :  { %1578 = vmatprep.subr.mxu0 %v900_v56 }
 0x89f   :  { %1579 = vmatpush3.msra.mxu0 %v900_v56 }
 0x8a0   :  { %1580 = vmatprep.subr.mxu0 %v898_v55 }
 0x8a1   :  { %1581 = vmatpush3.msra.mxu0 %v898_v55  ;;  %v987_v4 = vpop.permute.xlu0 %986 }
 0x8a2   :  { %1585 = vmatprep.subr.mxu0 %v1026_v49  ;;  %v1008_v11 = vsel %vm188_vm5, %v1928_v2, %v987_v4 }
 0x8a3   :  { %v1681_v57 = vpop.eup %1680  ;;  %v1010_v13 = vsel %vm274_vm6, %v1008_v11, %v995_v10  ;;  %v1259_v10 = vld [vmem:[%s2066_s5 + $0x10] sm:$0xff]  ;;  %v1258_v11 = vld [vmem:[%s2066_s5 + $0x8] sm:$0xff] }
 0x8a4   :  { %v896_v3 = vmul.f32 %v1681_v57, %v1677_v53  ;;  %v1162_v57 = vsub.s32 3, %v1846_v32 }
 0x8a5   :  { %v989_v5 = vpop.permute.xlu0 %988 }
 0x8a6   :  { %v1009_v19 = vsel %vm188_vm5, %v1926_v63, %v989_v5 }
 0x8a7   :  { %v1683_v58 = vpop.eup %1682 }
 0x8a8   :  { %v894_v62 = vmul.f32 %v1683_v58, %v1679_v54 }
 0x8a9   :  { %v997_v6 = vpop.permute.xlu0 %996 }
 0x8aa   :  { %1582 = vmatprep.mubr.msk.f32.mxu0 %vm274_vm6, %v894_v62  ;;  %v1011_v20 = vsel %vm274_vm6, %v1009_v19, %v997_v6  ;;  %v1163_v62 = vrot.slane %v1849_v37, %v1162_v57 }
 0x8ab   :  { %1583 = vmatmul.mubr.msk.f32.vlgmr.msra.gmra.mxu0 %vm274_vm6, %v896_v3 }
 0x8ac   :  { %1586 = vmatpush3.msra.mxu0 %v1026_v49  ;;  %v1150_v49 = vsub.s32 2, %v1846_v32 }
 0x8ad   :  { %1587 = vmatprep.subr.mxu0 %v1024_v60  ;;  %v1020_v7 = vpop.permute.xlu0 %1019 }
 0x8ae   :  { %1588 = vmatpush3.msra.mxu0 %v1024_v60  ;;  %v1151_v58 = vrot.slane %v1849_v37, %v1150_v49  ;;  %v1403_v49 = vsub.s32 5, %v1846_v32 }
 0x8af   :  { %1589 = vmatprep.subr.mxu0 %v1022_v17 }
 0x8b0   :  { %1590 = vmatpush3.msra.mxu0 %v1022_v17 }
 0x8b1   :  { %1591 = vmatprep.subr.mxu0 %v1020_v7 }
 0x8b2   :  { %1592 = vmatpush3.msra.mxu0 %v1020_v7 }
 0x8b3   :  { %1607 = vmatprep.subr.mxu0 %v1264_v39 }
 0x96b   :  { %v1584_v8 = vpop.f32.mrf.mxu0 }
 0x96d   :  { %v975_v9 = vpop.f32.mrf.mxu0 }
 0x96e   :  { %1002 = vrot.lane.b32.xlu1 %v975_v9, %s1759_s28  ;;  %v1260_v9 = vld [vmem:[%s2066_s5 + $0x18] sm:$0xff] }
 0x972   :  { %1004 = vrot.lane.b32.xlu1 %v1584_v8, %s1759_s28 }
 0x9e0   :  { %v1003_v12 = vpop.permute.xlu1 %1002 }
 0x9e1   :  { %v1013_v18 = vsel %vm1012_vm7, %v1010_v13, %v1003_v12  ;;  %v1257_v12 = vld [vmem:[%s2066_s5] sm:$0xff]  ;;  %v1172_v13 = vsub.s32 6, %v1846_v32  ;;  %s1760_s5 = smov [#allocation5]  }
 0x9e2   :  { %1593 = vmatprep.mubr.msk.f32.mxu0 %vm41_vm0, %v1013_v18  ;;  %s1414_s24 = sshll.u32 %s1760_s5, 4  ;;  %s1415_s24 = int_to_ptr.vmem [resolvable:$true] %s1414_s24 }
 0x9e3   :  { %v1173_v18 = vrot.slane %v1849_v37, %v1172_v13  ;;  %s1720_s25 = scalar_lea.vmem %s1415_s24, 256  ;;  %p1725_p6 = scmp.lt.s32.totalorder %s1415_s24, %s1415_s24 }
 0x9e4   :  { %v1005_v21 = vpop.permute.xlu1 %1004  ;;  %p1721_p5 = scmp.ne.s32.totalorder %s1415_s24, %s1720_s25  ;;  %p1726_p7 = scmp.lt.s32.totalorder %s1720_s25, %s1720_s25 }
 0x9e5   :  { %v1014_v22 = vsel %vm1012_vm7, %v1011_v20, %v1005_v21 }
 0x9e6   :  { %1594 = vmatmul.mubr.msk.f32.vlgmr.msra.gmra.mxu0 %vm41_vm0, %v1014_v22  ;;  %p1727_p8 = por %p1726_p7, %p1725_p6 }
 0x9e7   :  { %1608 = vmatpush3.msra.mxu0 %v1264_v39 }
 0x9e8   :  { %1609 = vmatprep.subr.mxu0 %v1263_v40  ;;  %p1728_p9 = pnand %p1727_p8, %p1721_p5 }
 0x9e9   :  { %1610 = vmatpush3.msra.mxu0 %v1263_v40 }
 0x9ea   :  { %1611 = vmatprep.subr.mxu0 %v1262_v41 }
 0x9eb   :  { %1612 = vmatpush3.msra.mxu0 %v1262_v41 }
 0x9ec   :  { %1613 = vmatprep.subr.mxu0 %v1261_v42 }
 0x9ed   :  { %1614 = vmatpush3.msra.mxu0 %v1261_v42 }
 0x9ee   :  { %1615 = vmatprep.subr.mxu0 %v1260_v9 }
 0x9ef   :  { %1616 = vmatpush3.msra.mxu0 %v1260_v9 }
 0x9f0   :  { %1617 = vmatprep.subr.mxu0 %v1259_v10 }
 0x9f1   :  { %1618 = vmatpush3.msra.mxu0 %v1259_v10 }
 0x9f2   :  { %1619 = vmatprep.subr.mxu0 %v1258_v11 }
 0x9f3   :  { %1620 = vmatpush3.msra.mxu0 %v1258_v11 }
 0x9f4   :  { %1621 = vmatprep.subr.mxu0 %v1257_v12 }
 0x9f5   :  { %1622 = vmatpush3.msra.mxu0 %v1257_v12 }
 0xaa6   :  { %v1595_v23 = vpop.f32.mrf.mxu0 }
 0xaa7   :  { %v1981_v24 = vadd.f32 %v1595_v23, %v1808_v1 }
 0xaa8   :  { %v1103_v2 = vpop.f32.mrf.mxu0 }
 0xaa9   :  { %v1984_v52 = vadd.f32 %v1103_v2, %v1803_v0  ;;  %v1117_v25 = vsel %vm41_vm0, %v1981_v24, 0.0 }
 0xaaa   :  { %1118 = vadd.xlane.f32.xlu1 %v1117_v25  ;;  %v1351_v25 = vsub.s32 7, %v1846_v32 }
 0xaab   :  { %v1114_v63 = vsel %vm41_vm0, %v1984_v52, 0.0 }
 0xaac   :  { %1115 = vadd.xlane.f32.xlu0 %v1114_v63  ;;  %v1352_v63 = vrot.slane %v1849_v37, %v1351_v25 }
 0xb33   :  { %v1119_v26 = vpop.xlane.xlu1 %1118 }
 0xb34   :  { %v1121_v27 = vmul.f32 0.03125, %v1119_v26 }
 0xb35   :  { %v1116_v28 = vpop.xlane.xlu0 %1115 }
 0xb36   :  { %v1120_v29 = vmul.f32 0.03125, %v1116_v28  ;;  %v1991_v30 = vsub.f32 %v1981_v24, %v1121_v27 }
 0xb38   :  { %v1122_v1 = vsub.f32 %v1984_v52, %v1120_v29  ;;  %v1125_v33 = vmul.f32 %v1991_v30, %v1991_v30  ;;  %v1153_v4 = vmul.f32 %v1151_v58, %v1991_v30 }
 0xb3a   :  { %v1124_v31 = vmul.f32 %v1122_v1, %v1122_v1  ;;  %v1129_v51 = vsel %vm41_vm0, %v1125_v33, 0.0  ;;  %v1152_v60 = vmul.f32 %v1151_v58, %v1122_v1  ;;  %v1404_v58 = vrot.slane %v1849_v37, %v1403_v49 }
 0xb3c   :  { %v1126_v0 = vsel %vm41_vm0, %v1124_v31, 0.0 }
 0xb3d   :  { %1127 = vadd.xlane.f32.xlu0 %v1126_v0 }
 0xb41   :  { %1130 = vadd.xlane.f32.xlu0 %v1129_v51 }
 0xbc6   :  { %v1128_v43 = vpop.xlane.xlu0 %1127 }
 0xbc7   :  { %v1132_v44 = vmul.f32 0.032258064, %v1128_v43 }
 0xbc9   :  { %1684 = vrsqrt.f32 %v1132_v44  ;;  %vm1136_vm8 = vcmp.eq.f32.partialorder %v1132_v44, inf  ;;  %v1139_v47 = vand.u32 2147483648, %v1132_v44  ;;  %vm1138_vm9 = vcmp.eq.f32.partialorder %v1132_v44, 0.0 }
 0xbca   :  { %v1131_v59 = vpop.xlane.xlu0 %1130 }
 0xbcb   :  { %v1133_v61 = vmul.f32 0.032258064, %v1131_v59 }
 0xbcd   :  { %1686 = vrsqrt.f32 %v1133_v61  ;;  %vm1143_vm10 = vcmp.eq.f32.partialorder %v1133_v61, inf  ;;  %v1146_v15 = vand.u32 2147483648, %v1133_v61  ;;  %vm1145_vm11 = vcmp.eq.f32.partialorder %v1133_v61, 0.0 }
 0xbd6   :  { %v1685_v45 = vpop.eup %1684 }
 0xbd7   :  { %v1135_v46 = vmul.f32 %v1685_v45, %v1132_v44 }
 0xbd9   :  { %v1137_v48 = vsel %vm1136_vm8, %v1132_v44, %v1135_v46 }
 0xbda   :  { %v1687_v53 = vpop.eup %1686  ;;  %v1140_v50 = vsel %vm1138_vm9, %v1139_v47, %v1137_v48 }
 0xbdb   :  { %v1154_v54 = vadd.f32 1e-06, %v1140_v50  ;;  %v1142_v14 = vmul.f32 %v1687_v53, %v1133_v61 }
 0xbdd   :  { %1688 = vrcp.f32 %v1154_v54  ;;  %v1144_v16 = vsel %vm1143_vm10, %v1133_v61, %v1142_v14 }
 0xbde   :  { %v1147_v55 = vsel %vm1145_vm11, %v1146_v15, %v1144_v16 }
 0xbdf   :  { %v1155_v56 = vadd.f32 1e-06, %v1147_v55  ;;  %v1391_v55 = vsub.s32 4, %v1846_v32 }
 0xbe1   :  { %1690 = vrcp.f32 %v1155_v56  ;;  %v1392_v56 = vrot.slane %v1849_v37, %v1391_v55 }
 0xbea   :  { %v1689_v3 = vpop.eup %1688 }
 0xbeb   :  { %v1157_v17 = vmul.f32 %v1689_v3, %v1152_v60 }
 0xbed   :  { %v1164_v5 = vadd.f32 %v1163_v62, %v1157_v17 }
 0xbee   :  { %v1691_v6 = vpop.eup %1690 }
 0xbef   :  { %v1159_v7 = vmul.f32 %v1691_v6, %v1153_v4  ;;  %1604 = vmatprep.mubr.msk.f32.mxu1 %vm41_vm0, %v1164_v5 }
 0xbf1   :  { %v1165_v8 = vadd.f32 %v1163_v62, %v1159_v7 }
 0xbf3   :  { %1605 = vmatmul.mubr.msk.f32.vlgmr.msra.gmra.mxu1 %vm41_vm0, %v1165_v8 }
 0xcb3   :  { %v1606_v19 = vpop.f32.mrf.mxu1 }
 0xcb4   :  { %v1252_v20 = vadd.f32 %v1606_v19, %v1173_v18 }
 0xcb5   :  { %v1246_v21 = vpop.f32.mrf.mxu1 }
 0xcb6   :  { %v1247_v22 = vadd.f32 %v1246_v21, %v1173_v18  ;;  %v1256_v2 = vmax.f32 %v1252_v20, 0.0 }
 0xcb8   :  { %v1255_v23 = vmax.f32 %v1247_v22, 0.0 }
 0xcba   :  { %1623 = vmatprep.mubr.msk.f32.mxu0 %vm1265_vm12, %v1255_v23 }
 0xcbb   :  { %1624 = vmatmul.mubr.msk.f32.vlgmr.msra.gmra.mxu0 %vm1265_vm12, %v1256_v2 }
 0xd7b   :  { %v1625_v26 = vpop.f32.mrf.mxu0 }
 0xd7c   :  { %v1348_v27 = vadd.f32 %v1625_v26, %v1981_v24 }
 0xd7d   :  { %v1338_v28 = vpop.f32.mrf.mxu0 }
 0xd7e   :  { %v1347_v29 = vadd.f32 %v1338_v28, %v1984_v52  ;;  %v1354_v30 = vadd.f32 %v1352_v63, %v1348_v27 }
 0xd80   :  { %v1358_v1 = vsel %vm41_vm0, %v1354_v30, 0.0  ;;  %v1353_v31 = vadd.f32 %v1352_v63, %v1347_v29 }
 0xd81   :  { %1359 = vadd.xlane.f32.xlu1 %v1358_v1 }
 0xd82   :  { %v1355_v0 = vsel %vm41_vm0, %v1353_v31, 0.0 }
 0xd83   :  { %1356 = vadd.xlane.f32.xlu0 %v1355_v0 }
 0xe0a   :  { %v1360_v33 = vpop.xlane.xlu1 %1359 }
 0xe0b   :  { %v1362_v51 = vmul.f32 0.03125, %v1360_v33 }
 0xe0c   :  { %v1357_v34 = vpop.xlane.xlu0 %1356 }
 0xe0d   :  { %v1364_v35 = vsub.f32 %v1354_v30, %v1362_v51  ;;  %v1361_v36 = vmul.f32 0.03125, %v1357_v34 }
 0xe0f   :  { %v1363_v38 = vsub.f32 %v1353_v31, %v1361_v36  ;;  %v1366_v39 = vmul.f32 %v1364_v35, %v1364_v35  ;;  %v1394_v57 = vmul.f32 %v1392_v56, %v1364_v35 }
 0xe11   :  { %v1370_v24 = vsel %vm41_vm0, %v1366_v39, 0.0  ;;  %v1365_v40 = vmul.f32 %v1363_v38, %v1363_v38  ;;  %v1393_v3 = vmul.f32 %v1392_v56, %v1363_v38 }
 0xe12   :  { %1371 = vadd.xlane.f32.xlu1 %v1370_v24 }
 0xe13   :  { %v1367_v52 = vsel %vm41_vm0, %v1365_v40, 0.0 }
 0xe14   :  { %1368 = vadd.xlane.f32.xlu0 %v1367_v52 }
 0xe9b   :  { %v1372_v41 = vpop.xlane.xlu1 %1371 }
 0xe9c   :  { %v1374_v42 = vmul.f32 0.032258064, %v1372_v41 }
 0xe9d   :  { %v1369_v43 = vpop.xlane.xlu0 %1368 }
 0xe9e   :  { %1692 = vrsqrt.f32 %v1374_v42  ;;  %v1373_v44 = vmul.f32 0.032258064, %v1369_v43  ;;  %vm1384_vm13 = vcmp.eq.f32.partialorder %v1374_v42, inf  ;;  %v1387_v45 = vand.u32 2147483648, %v1374_v42 }
 0xe9f   :  { %vm1386_vm14 = vcmp.eq.f32.partialorder %v1374_v42, 0.0 }
 0xea0   :  { %1694 = vrsqrt.f32 %v1373_v44  ;;  %vm1377_vm15 = vcmp.eq.f32.partialorder %v1373_v44, inf  ;;  %v1380_v54 = vand.u32 2147483648, %v1373_v44  ;;  %vm1379_vm1 = vcmp.eq.f32.partialorder %v1373_v44, 0.0 }
 0xeab   :  { %v1693_v59 = vpop.eup %1692 }
 0xeac   :  { %v1383_v61 = vmul.f32 %v1693_v59, %v1374_v42 }
 0xead   :  { %v1695_v46 = vpop.eup %1694 }
 0xeae   :  { %v1385_v47 = vsel %vm1384_vm13, %v1374_v42, %v1383_v61  ;;  %v1376_v53 = vmul.f32 %v1695_v46, %v1373_v44 }
 0xeaf   :  { %v1388_v48 = vsel %vm1386_vm14, %v1387_v45, %v1385_v47 }
 0xeb0   :  { %v1396_v50 = vadd.f32 1e-06, %v1388_v48  ;;  %v1378_v14 = vsel %vm1377_vm15, %v1373_v44, %v1376_v53 }
 0xeb1   :  { %v1381_v15 = vsel %vm1379_vm1, %v1380_v54, %v1378_v14 }
 0xeb2   :  { %1696 = vrcp.f32 %v1396_v50  ;;  %v1395_v16 = vadd.f32 1e-06, %v1381_v15 }
 0xeb4   :  { %1698 = vrcp.f32 %v1395_v16 }
 0xebf   :  { %v1697_v60 = vpop.eup %1696 }
 0xec0   :  { %v1400_v62 = vmul.f32 %v1697_v60, %v1394_v57 }
 0xec1   :  { %v1699_v17 = vpop.eup %1698 }
 0xec2   :  { %v1406_v4 = vadd.f32 %v1404_v58, %v1400_v62  ;;  %v1398_v5 = vmul.f32 %v1699_v17, %v1393_v3 }
 0xec4   :  { %1408 = vst.msk [vmem:[#allocation5 + $0x8] sm:$0xff] %vm41_vm0, %v1406_v4  ;;  %v1405_v6 = vadd.f32 %v1404_v58, %v1398_v5 }
 0xec6   :  { %1407 = vst.msk [vmem:[#allocation5] sm:$0xff] %vm41_vm0, %v1405_v6 }
 0xec7   :  { %1731 = shalt.err (!%p1728_p9)
}
 0xec8   :  { %s1761_s26 = smov 128  }
 0xec9   :  { %1420 = dma.vmem_to_hbm [thread:$0]  %s1415_s24, 256, %s2067_s6, [#allocation4], %s1761_s26, %s1761_s26, %s1758_s27  }
 0xeca   :  { %1742 = dma.done.wait [#allocation4], 256  }
 0xecb   :  { %1743 = vsyncadd [#allocation4], 4294967040 }
 0xecc   :  { %1424 = vsyncpa [#allocation3], 1 }
 0xecd   :  { %1425 = vsyncpa [#allocation4], 1 }

</bundles_post_ra>
